<compile_context>
chip_gen: v7x
topology: tpu7x:2x2x1
jax: 0.10.0
libtpu: 0.0.40
codegen_flags: <defaults>
</compile_context>

<pallas_src>
import functools
import math

import jax
import jax.numpy as jnp
import numpy as np
from jax.experimental import pallas as pl
from jax.experimental.pallas import tpu as pltpu

_TOKEN_TILE = 256                      # max slot tile (sublane axis), multiple of 16 (bf16)
_F_TILE = 512                          # preferred d_ff tile (lane axis), multiple of 256
_MOE_VMEM_BUDGET = 40 * 1024 * 1024    # double-buffered working-set target (fits v7x 64 MiB/TC)
_MOE_VMEM_LIMIT = 48 * 1024 * 1024
_ATTN_VMEM_LIMIT = 32 * 1024 * 1024


def _round_up(x, m):
    return ((x + m - 1) // m) * m


def _choose_attn_tile(S):
    for t in (256, 128):
        if S % t == 0:
            return t
    return S   # small / odd sequence lengths: single whole-S tile


def _choose_moe_tiles(c_pad, D, F):
    """Pick (slot tile, d_ff tile) keeping the double-buffered working set under budget."""
    def ws(tc, tf):
        # 2 buffers x 2 bytes (bf16) for x, W_a, W_b, W_down, out tiles + one f32 accumulator
        return 2 * 2 * (tc * D + 2 * D * tf + tf * D + tc * D) + 4 * tc * D

    tf = F if F <= _F_TILE else _F_TILE
    tc = c_pad if c_pad <= _TOKEN_TILE else _TOKEN_TILE
    # shrink the d_ff tile first (weights are streamed anyway), then the slot tile
    while ws(tc, tf) > _MOE_VMEM_BUDGET and tf % 256 == 0 and F % (tf // 2) == 0:
        tf //= 2
    while ws(tc, tf) > _MOE_VMEM_BUDGET and tc % 32 == 0 and c_pad % (tc // 2) == 0:
        tc //= 2
    return tc, tf


# ----------------------------------------------------------------------------
# Pallas kernel 1: grouped MoE expert FFN (SwiGLU), bf16 MXU ops, f32 accum.
# grid = (expert, slot-tile, d_ff-tile); d_ff is the reduction axis (last).
# Gate weight is NOT applied here (done once at the combine step).
# ----------------------------------------------------------------------------
def moe_expert_kernel(counts_ref, x_ref, wa_ref, wb_ref, wd_ref, out_ref, acc_ref, *, tc):
    e = pl.program_id(0)
    ci = pl.program_id(1)
    kf = pl.program_id(2)

    # skip slot tiles that contain no routed tokens (their outputs are never read back)
    @pl.when(ci * tc < counts_ref[e])
    def _():
        @pl.when(kf == 0)
        def _():
            acc_ref[...] = jnp.zeros_like(acc_ref)

        x = x_ref[...]                                                       # (tc, D) bf16
        h1 = jnp.dot(x, wa_ref[...], preferred_element_type=jnp.float32)     # value half
        h2 = jnp.dot(x, wb_ref[...], preferred_element_type=jnp.float32)     # gate half
        act = h1 * (h2 * jax.nn.sigmoid(h2))                                 # SwiGLU, f32
        acc_ref[...] += jnp.dot(act.astype(jnp.bfloat16), wd_ref[...],
                                preferred_element_type=jnp.float32)          # (tc, D)

        @pl.when(kf == pl.num_programs(2) - 1)
        def _():
            out_ref[...] = acc_ref[...].astype(out_ref.dtype)                # bf16 writeback


# ----------------------------------------------------------------------------
# Pallas kernel 2: banded flash sliding-window attention.
# grid = (B*H, q-tile, kv-band-tile); only KV tiles intersecting the window are visited.
# ----------------------------------------------------------------------------
def swa_flash_kernel(q_ref, k_ref, v_ref, o_ref, m_sc, l_sc, acc_sc, *,
                     window_size, tile, nb):
    qi = pl.program_id(1)
    b = pl.program_id(2)

    @pl.when(b == 0)
    def _():
        m_sc[...] = jnp.full_like(m_sc, -1e30)
        l_sc[...] = jnp.zeros_like(l_sc)
        acc_sc[...] = jnp.zeros_like(acc_sc)

    kv_tile = qi - (nb - 1) + b          # may be negative for early q tiles -> skip

    @pl.when(kv_tile >= 0)
    def _():
        q = q_ref[...]                                                        # (t, hd) bf16, pre-scaled
        k = k_ref[...]
        s = jax.lax.dot_general(q, k, (((1,), (1,)), ((), ())),
                                preferred_element_type=jnp.float32)           # (t, t) f32
        row = qi * tile + jax.lax.broadcasted_iota(jnp.int32, s.shape, 0)
        col = kv_tile * tile + jax.lax.broadcasted_iota(jnp.int32, s.shape, 1)
        diff = row - col
        s = jnp.where((diff < 0) | (diff >= window_size), -1e30, s)           # single select
        m_prev = m_sc[...]
        m_new = jnp.maximum(m_prev, jnp.max(s, axis=-1, keepdims=True))
        alpha = jnp.exp(m_prev - m_new)
        p = jnp.exp(s - m_new)
        # fully-masked rows produce garbage here but the diagonal KV tile (last band step) always
        # contains a valid key, so alpha == exp(-1e30 - m) == 0 wipes it before the finalize.
        l_sc[...] = alpha * l_sc[...] + jnp.sum(p, axis=-1, keepdims=True)
        acc_sc[...] = alpha * acc_sc[...] + jnp.dot(p.astype(v_ref.dtype), v_ref[...],
                                                    preferred_element_type=jnp.float32)
        m_sc[...] = m_new

    @pl.when(b == nb - 1)
    def _():
        o_ref[...] = (acc_sc[...] *
                      pl.reciprocal(l_sc[...], approx=True)).astype(o_ref.dtype)


# ----------------------------------------------------------------------------
# JAX glue helpers (memory-bound / tiny; XLA fuses these).
# ----------------------------------------------------------------------------
def rotate_half(x):
    x1, x2 = jnp.split(x, 2, axis=-1)
    return jnp.concatenate([-x2, x1], axis=-1)


def build_rope(dim, seq_len):
    inv_freq = 1.0 / (10000.0 ** (jnp.arange(0, dim, 2, dtype=jnp.float32) / dim))
    t = jnp.arange(seq_len, dtype=jnp.float32)
    freqs = jnp.einsum('i,j->ij', t, inv_freq)
    emb = jnp.concatenate([freqs, freqs], axis=-1)
    return jnp.cos(emb)[None, None], jnp.sin(emb)[None, None]


def rmsnorm(x, w, eps=1e-6):
    rms = jnp.sqrt(jnp.mean(x * x, axis=-1, keepdims=True) + eps)
    return x / rms * w


def prepare_params(raw, *, num_heads, max_seq_len):
    """One-time layout / dtype prep (hoisted out of the forward pass)."""
    F = raw['w2'].shape[2]
    w1 = raw['w1']
    w_a = jnp.transpose(w1[:, :F, :], (0, 2, 1))       # (E, D, F) value half
    w_b = jnp.transpose(w1[:, F:, :], (0, 2, 1))       # (E, D, F) silu half
    w_down = jnp.transpose(raw['w2'], (0, 2, 1))       # (E, F, D)
    if F > _F_TILE and F % _F_TILE != 0:
        # pad d_ff to a tile multiple (zero columns contribute exactly zero through SwiGLU)
        pad = _round_up(F, _F_TILE) - F
        w_a = jnp.pad(w_a, ((0, 0), (0, 0), (0, pad)))
        w_b = jnp.pad(w_b, ((0, 0), (0, 0), (0, pad)))
        w_down = jnp.pad(w_down, ((0, 0), (0, pad), (0, 0)))
    hd = raw['wq'].shape[0] // num_heads
    cos, sin = build_rope(hd, max_seq_len)
    return dict(
        wq=raw['wq'], wk=raw['wk'], wv=raw['wv'], wo=raw['wo'],
        norm0_w=raw['norm0_w'], norm1_w=raw['norm1_w'],
        gate_w=raw['gate_w'],
        w_a=w_a.astype(jnp.bfloat16),
        w_b=w_b.astype(jnp.bfloat16),
        w_down=w_down.astype(jnp.bfloat16),
        rope_cos=cos, rope_sin=sin,
    )


# ----------------------------------------------------------------------------
# GQA + sliding-window attention sublayer (projections / RoPE glue in JAX,
# banded flash attention core in Pallas).
# ----------------------------------------------------------------------------
def gqa_swa_attention(x, p, *, num_heads, num_kv_heads, window_size):
    B, S, D = x.shape
    hd = D // num_heads
    kv_hd = D // num_kv_heads
    group = num_heads // num_kv_heads

    q = (x @ p['wq'].T).reshape(B, S, num_heads, hd).transpose(0, 2, 1, 3)
    k = (x @ p['wk'].T).reshape(B, S, num_kv_heads, kv_hd).transpose(0, 2, 1, 3)
    v = (x @ p['wv'].T).reshape(B, S, num_kv_heads, kv_hd).transpose(0, 2, 1, 3)
    k = k.reshape(B, num_kv_heads, S, group, hd).transpose(0, 1, 3, 2, 4).reshape(B, num_heads, S, hd)
    v = v.reshape(B, num_kv_heads, S, group, hd).transpose(0, 1, 3, 2, 4).reshape(B, num_heads, S, hd)
    cos = p['rope_cos'][:, :, :S, :]
    sin = p['rope_sin'][:, :, :S, :]
    q = q * cos + rotate_half(q) * sin
    k = k * cos + rotate_half(k) * sin

    # fold 1/sqrt(hd) into q (O(S*hd) instead of O(S*S)); bf16 MXU operands, f32 accumulation
    q = (q * (1.0 / math.sqrt(hd))).astype(jnp.bfloat16)
    k = k.astype(jnp.bfloat16)
    v = v.astype(jnp.bfloat16)

    BH = B * num_heads
    q_f = q.reshape(BH, S, hd)
    k_f = k.reshape(BH, S, hd)
    v_f = v.reshape(BH, S, hd)

    tile = _choose_attn_tile(S)
    nq = S // tile
    nb = max(1, min(pl.cdiv(max(window_size - 1, 0), tile) + 1, nq))   # band tiles per q tile

    q_spec = pl.BlockSpec((None, tile, hd), lambda i, qi, b: (i, qi, 0))
    kv_spec = pl.BlockSpec((None, tile, hd),
                           lambda i, qi, b: (i, jnp.maximum(qi - (nb - 1) + b, 0), 0))

    of = pl.pallas_call(
        functools.partial(swa_flash_kernel, window_size=window_size, tile=tile, nb=nb),
        out_shape=jax.ShapeDtypeStruct((BH, S, hd), jnp.bfloat16),
        grid_spec=pltpu.PrefetchScalarGridSpec(
            num_scalar_prefetch=0,
            grid=(BH, nq, nb),
            in_specs=[q_spec, kv_spec, kv_spec],
            out_specs=pl.BlockSpec((None, tile, hd), lambda i, qi, b: (i, qi, 0)),
            scratch_shapes=[pltpu.VMEM((tile, 1), jnp.float32),
                            pltpu.VMEM((tile, 1), jnp.float32),
                            pltpu.VMEM((tile, hd), jnp.float32)]),
        compiler_params=pltpu.CompilerParams(
            dimension_semantics=("parallel", "parallel", "arbitrary"),
            vmem_limit_bytes=_ATTN_VMEM_LIMIT),
    )(q_f, k_f, v_f)

    out = of.reshape(B, num_heads, S, hd).transpose(0, 2, 1, 3).reshape(B, S, D)
    # TODO(synk): attention dropout omitted (eval-mode identity).
    return out @ p['wo'].T


# ----------------------------------------------------------------------------
# MoE FFN sublayer: JAX routing glue + grouped Pallas expert kernel + gather combine.
# ----------------------------------------------------------------------------
def moe_ffn_pallas(x, p, *, top_k, capacity_factor):
    B, S, D = x.shape
    E, _, Fp = p['w_a'].shape
    T = B * S
    flat_x = x.reshape(T, D)

    # ---- gating + routing glue (E << 128 lanes -> plain JAX, fused by XLA) ----
    scores = jax.nn.softmax(flat_x @ p['gate_w'].T, axis=-1)          # (T, E) f32
    topk_vals, topk_idx = jax.lax.top_k(scores, top_k)                # (T, K)
    phi_mean = jnp.mean(scores, axis=0)
    aux_loss = E * jnp.sum(phi_mean * phi_mean)
    # TODO(synk): training-mode gate noise (randn * noise_std) omitted (eval semantics).

    one_hot = jax.nn.one_hot(topk_idx, E, dtype=scores.dtype)
    w_dense = jnp.sum(one_hot * topk_vals[..., None], axis=1)         # (T, E)
    routed = jnp.any(topk_idx[..., None] == jnp.arange(E), axis=1)    # (T, E)
    w_rank = jnp.where(routed, w_dense, -jnp.inf)

    capacity = max(1, int(capacity_factor * T / E))
    capacity = min(capacity, T)
    c_pad = _round_up(capacity, 8)
    if c_pad > _TOKEN_TILE:
        c_pad = _round_up(c_pad, _TOKEN_TILE)

    # argsort-based per-expert ranking (same tie-break as the dense reference); keep the top
    # `capacity` routed tokens per expert (capacity dropping).
    order = jnp.argsort(-w_rank, axis=0)                              # (T, E)
    ranks = jnp.argsort(order, axis=0)                                # (T, E) inverse permutation
    dispatch = order[:capacity, :].T                                  # (E, capacity) token ids
    dispatch = jnp.pad(dispatch, ((0, 0), (0, c_pad - capacity)))     # padded slots -> token 0
    counts = jnp.minimum(jnp.sum(routed.astype(jnp.int32), axis=0),
                         jnp.int32(capacity))                         # (E,) valid slots/expert

    # gather routed tokens per expert; bf16 MXU operands.
    # TODO(synk): gather could be moved in-kernel (scalar-prefetched dispatch + manual DMA) to
    # avoid this HBM round trip of the grouped activations.
    x_grp = jnp.take(flat_x.astype(jnp.bfloat16), dispatch, axis=0)   # (E, c_pad, D)

    tc, tf = _choose_moe_tiles(c_pad, D, Fp)
    grid = (E, c_pad // tc, Fp // tf)
    # TODO(synk): when c_pad > tc the expert weights are re-streamed per slot tile; a
    # weight-stationary emit_pipeline restructure would remove that traffic.

    out_grp = pl.pallas_call(
        functools.partial(moe_expert_kernel, tc=tc),
        out_shape=jax.ShapeDtypeStruct((E, c_pad, D), jnp.bfloat16),
        grid_spec=pltpu.PrefetchScalarGridSpec(
            num_scalar_prefetch=1,
            grid=grid,
            in_specs=[
                pl.BlockSpec((None, tc, D), lambda e, ci, kf, cnt: (e, ci, 0)),   # token slots
                pl.BlockSpec((None, D, tf), lambda e, ci, kf, cnt: (e, 0, kf)),   # W_a
                pl.BlockSpec((None, D, tf), lambda e, ci, kf, cnt: (e, 0, kf)),   # W_b
                pl.BlockSpec((None, tf, D), lambda e, ci, kf, cnt: (e, kf, 0)),   # W_down
            ],
            out_specs=pl.BlockSpec((None, tc, D), lambda e, ci, kf, cnt: (e, ci, 0)),
            scratch_shapes=[pltpu.VMEM((tc, D), jnp.float32)]),
        compiler_params=pltpu.CompilerParams(
            dimension_semantics=("parallel", "parallel", "arbitrary"),
            vmem_limit_bytes=_MOE_VMEM_LIMIT),
    )(counts, x_grp, p['w_a'], p['w_b'], p['w_down'])

    # ---- combine: per-token gather of its top-k slot outputs (no serialized scatter-add).
    # Gate weight is applied here exactly once; dropped / padded slots are masked out, so any
    # garbage in skipped slot tiles is never read.
    rank_tk = jnp.take_along_axis(ranks, topk_idx, axis=1)            # (T, K)
    kept = rank_tk < capacity
    slot_idx = jnp.where(kept, topk_idx * c_pad + rank_tk, 0)
    gathered = jnp.take(out_grp.reshape(E * c_pad, D), slot_idx.reshape(-1), axis=0)
    gathered = gathered.reshape(T, top_k, D).astype(jnp.float32)
    contrib = jnp.where(kept[..., None], topk_vals[..., None] * gathered, 0.0)
    combined = jnp.sum(contrib, axis=1)                               # (T, D) f32
    return combined.reshape(B, S, D), aux_loss


# ----------------------------------------------------------------------------
# Full decoder block forward (eval mode: dropout = identity).
# ----------------------------------------------------------------------------
def decoder_block_moe_forward(x, p, *, num_heads, num_kv_heads, window_size,
                              top_k, capacity_factor):
    attn = gqa_swa_attention(rmsnorm(x, p['norm0_w']), p,
                             num_heads=num_heads, num_kv_heads=num_kv_heads,
                             window_size=window_size)
    x1 = x + attn
    moe, aux = moe_ffn_pallas(rmsnorm(x1, p['norm1_w']), p,
                              top_k=top_k, capacity_factor=capacity_factor)
    return x1 + moe, aux


# ----------------------------------------------------------------------------
# Pure-JAX references mirroring the PyTorch module (eval mode).
# ----------------------------------------------------------------------------
def attention_sublayer_ref(x, raw, *, num_heads, num_kv_heads, window_size, max_seq_len):
    B, S, D = x.shape
    hd = D // num_heads
    kv_hd = D // num_kv_heads
    group = num_heads // num_kv_heads
    h = rmsnorm(x, raw['norm0_w'])
    q = (h @ raw['wq'].T).reshape(B, S, num_heads, hd).transpose(0, 2, 1, 3)
    k = (h @ raw['wk'].T).reshape(B, S, num_kv_heads, kv_hd).transpose(0, 2, 1, 3)
    v = (h @ raw['wv'].T).reshape(B, S, num_kv_heads, kv_hd).transpose(0, 2, 1, 3)
    k = k.reshape(B, num_kv_heads, S, group, hd).transpose(0, 1, 3, 2, 4).reshape(B, num_heads, S, hd)
    v = v.reshape(B, num_kv_heads, S, group, hd).transpose(0, 1, 3, 2, 4).reshape(B, num_heads, S, hd)
    cos, sin = build_rope(hd, max_seq_len)
    cos = cos[:, :, :S, :]
    sin = sin[:, :, :S, :]
    q = q * cos + rotate_half(q) * sin
    k = k * cos + rotate_half(k) * sin
    scores = jnp.einsum('bhqd,bhkd->bhqk', q, k) / math.sqrt(hd)
    i = jnp.arange(S)[:, None]
    j = jnp.arange(S)[None, :]
    diff = i - j
    mask = jnp.where((diff < 0) | (diff >= window_size), -jnp.inf, 0.0)
    attn = jax.nn.softmax(scores + mask[None, None], axis=-1)
    ao = jnp.einsum('bhqk,bhkd->bhqd', attn, v)
    ao = ao.transpose(0, 2, 1, 3).reshape(B, S, D) @ raw['wo'].T
    return x + ao


def moe_sublayer_ref(x1, raw, *, top_k, capacity_factor):
    B, S, D = x1.shape
    E = raw['gate_w'].shape[0]
    F = raw['w2'].shape[2]
    T = B * S
    flat = rmsnorm(x1, raw['norm1_w']).reshape(T, D)
    gs = jax.nn.softmax(flat @ raw['gate_w'].T, axis=-1)
    tv, ti = jax.lax.top_k(gs, top_k)
    phi = jnp.mean(gs, axis=0)
    aux = E * jnp.sum(phi * phi)
    one_hot = jax.nn.one_hot(ti, E, dtype=gs.dtype)
    wd = jnp.sum(one_hot * tv[..., None], axis=1)
    routed = jnp.any(ti[..., None] == jnp.arange(E), axis=1)
    cap = max(1, int(capacity_factor * T / E))
    wr = jnp.where(routed, wd, -jnp.inf)
    ranks = jnp.argsort(jnp.argsort(-wr, axis=0), axis=0)
    fw = jnp.where(routed & (ranks < cap), wd, 0.0)
    out = jnp.zeros_like(flat)
    for e in range(E):
        he = flat @ raw['w1'][e].T
        a1, a2 = he[:, :F], he[:, F:]
        act = a1 * (a2 * jax.nn.sigmoid(a2))
        out = out + fw[:, e:e + 1] * (act @ raw['w2'][e].T)
    return out.reshape(B, S, D), aux


# ----------------------------------------------------------------------------
if __name__ == "__main__":
    B, S = 2, 8
    d_model, d_ff = 64, 64
    num_heads, num_kv_heads = 4, 2
    num_experts, top_k = 4, 2
    window_size = 4
    capacity_factor = 1.0
    max_seq_len = 64

    key = jax.random.PRNGKey(0)
    ks = jax.random.split(key, 8)
    x = jax.random.normal(ks[0], (B, S, d_model), jnp.float32)
    raw = dict(
        wq=jax.random.normal(ks[1], (d_model, d_model), jnp.float32) * 0.05,
        wk=jax.random.normal(ks[2], (d_model, d_model), jnp.float32) * 0.05,
        wv=jax.random.normal(ks[3], (d_model, d_model), jnp.float32) * 0.05,
        wo=jax.random.normal(ks[4], (d_model, d_model), jnp.float32) * 0.05,
        gate_w=jax.random.normal(ks[5], (num_experts, d_model), jnp.float32) * 0.05,
        w1=jax.random.normal(ks[6], (num_experts, 2 * d_ff, d_model), jnp.float32) * 0.05,
        w2=jax.random.normal(ks[7], (num_experts, d_model, d_ff), jnp.float32) * 0.05,
        norm0_w=jnp.ones((d_model,), jnp.float32),
        norm1_w=jnp.ones((d_model,), jnp.float32),
    )

    prepared = prepare_params(raw, num_heads=num_heads, max_seq_len=max_seq_len)

    out, aux = decoder_block_moe_forward(
        x, prepared, num_heads=num_heads, num_kv_heads=num_kv_heads,
        window_size=window_size, top_k=top_k, capacity_factor=capacity_factor)
    out = jax.block_until_ready(out)
    aux = jax.block_until_ready(aux)

    # --- correctness checks ---
    # Attention sublayer vs. f32 reference (bf16 MXU operands -> modest tolerance).
    x1_k = x + gqa_swa_attention(rmsnorm(x, prepared['norm0_w']), prepared,
                                 num_heads=num_heads, num_kv_heads=num_kv_heads,
                                 window_size=window_size)
    x1_r = attention_sublayer_ref(x, raw, num_heads=num_heads, num_kv_heads=num_kv_heads,
                                  window_size=window_size, max_seq_len=max_seq_len)
    assert np.allclose(np.asarray(x1_k), np.asarray(x1_r), rtol=2e-2, atol=2e-2), \
        float(jnp.max(jnp.abs(x1_k - x1_r)))

    # MoE sublayer vs. dense f32 reference fed the SAME post-attention activations, so the f32
    # routing decisions are bit-identical and only bf16 expert-matmul error is measured.
    moe_k, aux_k = moe_ffn_pallas(rmsnorm(x1_k, prepared['norm1_w']), prepared,
                                  top_k=top_k, capacity_factor=capacity_factor)
    moe_r, aux_r = moe_sublayer_ref(x1_k, raw, top_k=top_k, capacity_factor=capacity_factor)
    assert np.allclose(np.asarray(moe_k), np.asarray(moe_r), rtol=2e-2, atol=2e-2), \
        float(jnp.max(jnp.abs(moe_k - moe_r)))
    assert np.allclose(float(aux_k), float(aux_r), rtol=1e-3, atol=1e-5)

    # Full forward is the composition of the two verified sublayers.
    assert np.allclose(np.asarray(out), np.asarray(x1_k + moe_k), rtol=1e-2, atol=1e-2)
    assert np.allclose(float(aux), float(aux_k), rtol=1e-3, atol=1e-5)

    print("KERNEL_OK")
</pallas_src>

<mosaic_0001>
module attributes {stable_mosaic.version = 11 : i64} {
  func.func @swa_flash_kernel(%arg0: i32, %arg1: i32, %arg2: i32, %arg3: memref<1x8x16xbf16, #tpu.memory_space<vmem>>, %arg4: memref<1x8x16xbf16, #tpu.memory_space<vmem>>, %arg5: memref<1x8x16xbf16, #tpu.memory_space<vmem>>, %arg6: memref<1x8x16xbf16, #tpu.memory_space<vmem>>, %arg7: memref<8x1xf32, #tpu.memory_space<vmem>>, %arg8: memref<8x1xf32, #tpu.memory_space<vmem>>, %arg9: memref<8x16xf32, #tpu.memory_space<vmem>>) attributes {dimension_semantics = [#tpu.dimension_semantics<parallel>, #tpu.dimension_semantics<parallel>, #tpu.dimension_semantics<arbitrary>], iteration_bounds = array<i64: 8, 1, 1>, scalar_prefetch = 0 : i64, scratch_operands = 3 : i64, tpu.core_type = #tpu.core_type<tc>, window_params = [{transform_indices = @transform_0, window_bounds = array<i64: 1, 8, 16>}, {transform_indices = @transform_1, window_bounds = array<i64: 1, 8, 16>}, {transform_indices = @transform_2, window_bounds = array<i64: 1, 8, 16>}, {transform_indices = @transform_3, window_bounds = array<i64: 1, 8, 16>}]} {
    %c0_i32 = arith.constant 0 : i32
    %0 = arith.cmpi eq, %arg2, %c0_i32 : i32
    %1 = arith.extui %0 : i1 to i32
    %c0_i32_0 = arith.constant 0 : i32
    %2 = arith.cmpi ne, %1, %c0_i32_0 : i32
    scf.if %2 {
      %cst = arith.constant -1.000000e+30 : f32
      %11 = vector.broadcast %cst : f32 to vector<8x1xf32>
      %c0 = arith.constant 0 : index
      %c0_6 = arith.constant 0 : index
      %12 = vector.load %arg7[%c0, %c0_6] : memref<8x1xf32, #tpu.memory_space<vmem>>, vector<8x1xf32>
      tpu.vector_store %arg7[%c0, %c0_6], %11 {strides = array<i32>} : memref<8x1xf32, #tpu.memory_space<vmem>>, vector<8x1xf32>,
      %cst_7 = arith.constant 0.000000e+00 : f32
      %13 = vector.broadcast %cst_7 : f32 to vector<8x1xf32>
      %c0_8 = arith.constant 0 : index
      %c0_9 = arith.constant 0 : index
      %14 = vector.load %arg8[%c0_8, %c0_9] : memref<8x1xf32, #tpu.memory_space<vmem>>, vector<8x1xf32>
      tpu.vector_store %arg8[%c0_8, %c0_9], %13 {strides = array<i32>} : memref<8x1xf32, #tpu.memory_space<vmem>>, vector<8x1xf32>,
      %cst_10 = arith.constant 0.000000e+00 : f32
      %15 = vector.broadcast %cst_10 : f32 to vector<8x16xf32>
      %c0_11 = arith.constant 0 : index
      %c0_12 = arith.constant 0 : index
      %16 = vector.load %arg9[%c0_11, %c0_12] : memref<8x16xf32, #tpu.memory_space<vmem>>, vector<8x16xf32>
      tpu.vector_store %arg9[%c0_11, %c0_12], %15 {strides = array<i32>} : memref<8x16xf32, #tpu.memory_space<vmem>>, vector<8x16xf32>,
    } else {
    }
    %c0_i32_1 = arith.constant 0 : i32
    %3 = arith.subi %arg1, %c0_i32_1 : i32
    %4 = arith.addi %3, %arg2 : i32
    %c0_i32_2 = arith.constant 0 : i32
    %5 = arith.cmpi sge, %4, %c0_i32_2 : i32
    %6 = arith.extui %5 : i1 to i32
    %c0_i32_3 = arith.constant 0 : i32
    %7 = arith.cmpi ne, %6, %c0_i32_3 : i32
    scf.if %7 {
      %c0 = arith.constant 0 : index
      %c0_6 = arith.constant 0 : index
      %c0_7 = arith.constant 0 : index
      %11 = vector.load %arg3[%c0, %c0_6, %c0_7] : memref<1x8x16xbf16, #tpu.memory_space<vmem>>, vector<1x8x16xbf16>
      %12 = vector.shape_cast %11 : vector<1x8x16xbf16> to vector<8x16xbf16>
      %c0_8 = arith.constant 0 : index
      %c0_9 = arith.constant 0 : index
      %c0_10 = arith.constant 0 : index
      %13 = vector.load %arg4[%c0_8, %c0_9, %c0_10] : memref<1x8x16xbf16, #tpu.memory_space<vmem>>, vector<1x8x16xbf16>
      %14 = vector.shape_cast %13 : vector<1x8x16xbf16> to vector<8x16xbf16>
      %cst = arith.constant dense<0.000000e+00> : vector<8x8xf32>
      %15 = tpu.matmul %12, %14, %cst {dimension_numbers = #tpu.dot_dimension_numbers<[1], [1], [0], [0], [0, 0, 1, 0], [], []>} : vector<8x16xbf16>, vector<8x16xbf16>, vector<8x8xf32> -> vector<8x8xf32>
      %c8_i32 = arith.constant 8 : i32
      %16 = arith.muli %arg1, %c8_i32 : i32
      %17 = tpu.iota {dimensions = array<i32: 0>} : vector<8x8xi32>
      %18 = vector.broadcast %16 : i32 to vector<8x8xi32>
      %19 = arith.addi %18, %17 : vector<8x8xi32>
      %c8_i32_11 = arith.constant 8 : i32
      %20 = arith.muli %4, %c8_i32_11 : i32
      %21 = tpu.iota {dimensions = array<i32: 1>} : vector<8x8xi32>
      %22 = vector.broadcast %20 : i32 to vector<8x8xi32>
      %23 = arith.addi %22, %21 : vector<8x8xi32>
      %24 = arith.subi %19, %23 : vector<8x8xi32>
      %c0_i32_12 = arith.constant 0 : i32
      %25 = vector.broadcast %c0_i32_12 : i32 to vector<8x8xi32>
      %26 = arith.cmpi slt, %24, %25 : vector<8x8xi32>
      %c4_i32 = arith.constant 4 : i32
      %27 = vector.broadcast %c4_i32 : i32 to vector<8x8xi32>
      %28 = arith.cmpi sge, %24, %27 : vector<8x8xi32>
      %29 = arith.ori %26, %28 : vector<8x8xi1>
      %cst_13 = arith.constant -1.000000e+30 : f32
      %30 = vector.broadcast %cst_13 : f32 to vector<8x8xf32>
      %31 = arith.select %29, %30, %15 : vector<8x8xi1>, vector<8x8xf32>
      %c0_14 = arith.constant 0 : index
      %c0_15 = arith.constant 0 : index
      %32 = vector.load %arg7[%c0_14, %c0_15] : memref<8x1xf32, #tpu.memory_space<vmem>>, vector<8x1xf32>
      %cst_16 = arith.constant dense<0xFF800000> : vector<8xf32>
      %33 = vector.multi_reduction <maximumf>, %31, %cst_16 [1] : vector<8x8xf32> to vector<8xf32>
      %34 = vector.shape_cast %33 : vector<8xf32> to vector<8x1xf32>
      %35 = arith.maximumf %32, %34 : vector<8x1xf32>
      %36 = arith.subf %32, %35 : vector<8x1xf32>
      %37 = math.exp %36 : vector<8x1xf32>
      %38 = vector.broadcast %35 : vector<8x1xf32> to vector<8x8xf32>
      %39 = arith.subf %31, %38 : vector<8x8xf32>
      %40 = math.exp %39 : vector<8x8xf32>
      %c0_17 = arith.constant 0 : index
      %c0_18 = arith.constant 0 : index
      %41 = vector.load %arg8[%c0_17, %c0_18] : memref<8x1xf32, #tpu.memory_space<vmem>>, vector<8x1xf32>
      %42 = arith.mulf %37, %41 : vector<8x1xf32>
      %cst_19 = arith.constant dense<0.000000e+00> : vector<8xf32>
      %43 = vector.multi_reduction <add>, %40, %cst_19 [1] : vector<8x8xf32> to vector<8xf32>
      %44 = vector.shape_cast %43 : vector<8xf32> to vector<8x1xf32>
      %45 = arith.addf %42, %44 : vector<8x1xf32>
      %c0_20 = arith.constant 0 : index
      %c0_21 = arith.constant 0 : index
      %46 = vector.load %arg8[%c0_20, %c0_21] : memref<8x1xf32, #tpu.memory_space<vmem>>, vector<8x1xf32>
      tpu.vector_store %arg8[%c0_20, %c0_21], %45 {strides = array<i32>} : memref<8x1xf32, #tpu.memory_space<vmem>>, vector<8x1xf32>,
      %c0_22 = arith.constant 0 : index
      %c0_23 = arith.constant 0 : index
      %47 = vector.load %arg9[%c0_22, %c0_23] : memref<8x16xf32, #tpu.memory_space<vmem>>, vector<8x16xf32>
      %48 = vector.broadcast %37 : vector<8x1xf32> to vector<8x16xf32>
      %49 = arith.mulf %48, %47 : vector<8x16xf32>
      %50 = arith.truncf %40 : vector<8x8xf32> to vector<8x8xbf16>
      %c0_24 = arith.constant 0 : index
      %c0_25 = arith.constant 0 : index
      %c0_26 = arith.constant 0 : index
      %51 = vector.load %arg5[%c0_24, %c0_25, %c0_26] : memref<1x8x16xbf16, #tpu.memory_space<vmem>>, vector<1x8x16xbf16>
      %52 = vector.shape_cast %51 : vector<1x8x16xbf16> to vector<8x16xbf16>
      %cst_27 = arith.constant dense<0.000000e+00> : vector<8x16xf32>
      %53 = tpu.matmul %50, %52, %cst_27 {dimension_numbers = #tpu.dot_dimension_numbers<[1], [0], [0], [1], [0, 0, 1, 1], [], []>} : vector<8x8xbf16>, vector<8x16xbf16>, vector<8x16xf32> -> vector<8x16xf32>
      %54 = arith.addf %49, %53 : vector<8x16xf32>
      %c0_28 = arith.constant 0 : index
      %c0_29 = arith.constant 0 : index
      %55 = vector.load %arg9[%c0_28, %c0_29] : memref<8x16xf32, #tpu.memory_space<vmem>>, vector<8x16xf32>
      tpu.vector_store %arg9[%c0_28, %c0_29], %54 {strides = array<i32>} : memref<8x16xf32, #tpu.memory_space<vmem>>, vector<8x16xf32>,
      %c0_30 = arith.constant 0 : index
      %c0_31 = arith.constant 0 : index
      %56 = vector.load %arg7[%c0_30, %c0_31] : memref<8x1xf32, #tpu.memory_space<vmem>>, vector<8x1xf32>
      tpu.vector_store %arg7[%c0_30, %c0_31], %35 {strides = array<i32>} : memref<8x1xf32, #tpu.memory_space<vmem>>, vector<8x1xf32>,
    } else {
    }
    %c0_i32_4 = arith.constant 0 : i32
    %8 = arith.cmpi eq, %arg2, %c0_i32_4 : i32
    %9 = arith.extui %8 : i1 to i32
    %c0_i32_5 = arith.constant 0 : i32
    %10 = arith.cmpi ne, %9, %c0_i32_5 : i32
    scf.if %10 {
      %c0 = arith.constant 0 : index
      %c0_6 = arith.constant 0 : index
      %11 = vector.load %arg9[%c0, %c0_6] : memref<8x16xf32, #tpu.memory_space<vmem>>, vector<8x16xf32>
      %c0_7 = arith.constant 0 : index
      %c0_8 = arith.constant 0 : index
      %12 = vector.load %arg8[%c0_7, %c0_8] : memref<8x1xf32, #tpu.memory_space<vmem>>, vector<8x1xf32>
      %13 = tpu.reciprocal %12 {approx = true} : vector<8x1xf32> -> vector<8x1xf32>
      %14 = vector.broadcast %13 : vector<8x1xf32> to vector<8x16xf32>
      %15 = arith.mulf %11, %14 : vector<8x16xf32>
      %16 = arith.truncf %15 : vector<8x16xf32> to vector<8x16xbf16>
      %c0_9 = arith.constant 0 : index
      %c0_10 = arith.constant 0 : index
      %c0_11 = arith.constant 0 : index
      %17 = vector.load %arg6[%c0_9, %c0_10, %c0_11] : memref<1x8x16xbf16, #tpu.memory_space<vmem>>, vector<1x8x16xbf16>
      %18 = vector.shape_cast %17 : vector<1x8x16xbf16> to vector<8x16xbf16>
      %19 = vector.shape_cast %16 : vector<8x16xbf16> to vector<1x8x16xbf16>
      tpu.vector_store %arg6[%c0_9, %c0_10, %c0_11], %19 {strides = array<i32>} : memref<1x8x16xbf16, #tpu.memory_space<vmem>>, vector<1x8x16xbf16>,
    } else {
    }
    return
  }
  func.func @transform_0(%arg0: i32, %arg1: i32, %arg2: i32) -> (i32, i32, i32) {
    %c0_i32 = arith.constant 0 : i32
    %c0_i32_0 = arith.constant 0 : i32
    return %arg0, %arg1, %c0_i32 : i32, i32, i32
  }
  func.func @transform_1(%arg0: i32, %arg1: i32, %arg2: i32) -> (i32, i32, i32) {
    %c0_i32 = arith.constant 0 : i32
    %0 = arith.subi %arg1, %c0_i32 : i32
    %1 = arith.addi %0, %arg2 : i32
    %c0_i32_0 = arith.constant 0 : i32
    %2 = arith.maxsi %1, %c0_i32_0 : i32
    %c0_i32_1 = arith.constant 0 : i32
    %c0_i32_2 = arith.constant 0 : i32
    return %arg0, %2, %c0_i32_1 : i32, i32, i32
  }
  func.func @transform_2(%arg0: i32, %arg1: i32, %arg2: i32) -> (i32, i32, i32) {
    %c0_i32 = arith.constant 0 : i32
    %0 = arith.subi %arg1, %c0_i32 : i32
    %1 = arith.addi %0, %arg2 : i32
    %c0_i32_0 = arith.constant 0 : i32
    %2 = arith.maxsi %1, %c0_i32_0 : i32
    %c0_i32_1 = arith.constant 0 : i32
    %c0_i32_2 = arith.constant 0 : i32
    return %arg0, %2, %c0_i32_1 : i32, i32, i32
  }
  func.func @transform_3(%arg0: i32, %arg1: i32, %arg2: i32) -> (i32, i32, i32) {
    %c0_i32 = arith.constant 0 : i32
    %c0_i32_0 = arith.constant 0 : i32
    return %arg0, %arg1, %c0_i32 : i32, i32, i32
  }
}

</mosaic_0001>

<bundles_post_ra>
// kernel: tpu_custom_call.1
= control target key start
LH: loop header
LB: loop body
LE: loop exit
PB: predicated region body
PF: predicated region fallthrough
CT: control target
= control target key end

     0   :  { %s1232_s0 = inlined_call_operand.hbm [shape: bf16[8,8,16], index: 0, kind: input, shape index: {}]   ;;  %s1233_s1 = inlined_call_operand.hbm [shape: bf16[8,8,16], index: 1, kind: input, shape index: {}]   ;;  %s1234_s2 = inlined_call_operand.hbm [shape: bf16[8,8,16], index: 2, kind: input, shape index: {}]   ;;  %s1235_s3 = inlined_call_operand.hbm [shape: bf16[8,8,16], index: 3, kind: output, shape index: {}]  }
   0x1   :  { %1241 = sst [smem:[#allocation18_spill]] %s1233_s1 }
   0x2   :  { %8 = vsyncpa [#allocation6], 0 }
   0x3   :  { %10 = vsyncpa [#allocation6 + $0x1], 0 }
   0x4   :  { %11 = vsyncpa [#allocation9], 0 }
   0x5   :  { %13 = vsyncpa [#allocation9 + $0x1], 0 }
   0x6   :  { %14 = vsyncpa [#allocation7], 0 }
   0x7   :  { %16 = vsyncpa [#allocation7 + $0x1], 0  ;;  %s959_s12 = smov 0   ;;  %s961_s13 = smov 0  }
   0x8   :  { %s963_s14 = smov 0   ;;  %s965_s15 = smov 0  }
   0x9   :  { %s967_s16 = smov 0   ;;  %s969_s17 = smov 0  }
   0xa LB: > { %1242 = sst [smem:[#allocation15_spill]] %s925_s16  ;;  %s990_s18 = sadd.s32 4294967295, %s929_s17   ;;  %s929_s17 = sphi %s969_s17, %s22_s17   ;;  %s925_s16 = sphi %s967_s16, %s1262_s16   ;;  %s921_s15 = sphi %s965_s15, %s1261_s15   ;;  %s917_s14 = sphi %s963_s14, %s1265_s14   ;;  %s913_s13 = sphi %s961_s13, %s1264_s13   ;;  %s909_s12 = sphi %s959_s12, %s1263_s12  }
   0xb   : > { %s633_s19 = sadd.s32 4294967294, %s929_s17   ;;  %s41_s20 = sadd.s32 1, %s925_s16 }
   0xc   : > { %s50_s21 = sadd.s32 1, %s917_s14  ;;  %p43_p0 = scmp.ge.s32.totalorder %s41_s20, 8 }
   0xd   : > { %p57_p1 = scmp.ne.s32.totalorder %s917_s14, %s913_s13  ;;  %p58_p2 = scmp.eq.s32.totalorder %s929_s17, 0 }
   0xe   : > { %p63_p3 = scmp.ne.s32.totalorder %s913_s13, %s909_s12  ;;  %s1267_s20 = smov (%p43_p0, %s41_s20), 0 }
   0xf   : > { %1243 = sst [smem:[#allocation16_spill]] %s1267_s20  ;;  %p1002_p4 = por %p58_p2, %p57_p1 }
  0x10   : > { %p64_p5 = scmp.eq.s32.totalorder %s990_s18, 0  ;;  %s45_s23 = ssub.s32 %s925_s16, %s1267_s20 }
  0x11   : > { %p157_p6 = scmp.eq.s32.totalorder %s990_s18, 7  ;;  %p48_p7 = scmp.eq.s32.totalorder %s45_s23, 0 }
  0x12   : > { %p1010_p8 = por %p64_p5, %p63_p3  ;;  %p163_p10 = scmp.eq.s32.totalorder %s633_s19, 7 }
  0x13   : > { %p1014_p9 = por %p157_p6, %p57_p1  ;;  %p691_p12 = scmp.lt.s32.totalorder %s929_s17, 8 }
  0x14   : > { %s1245_s24 = scalar_select %p1010_p8, 1, 0 }
  0x15   : > { %s1246_s25 = scalar_select %p1014_p9, 1, 0 }
  0x16   : > { %s1019_s26 = scalar_select %p48_p7, %s917_s14, %s50_s21  }
  0x17   : > { %p1021_p11 = por %p163_p10, %p63_p3  ;;  %s183_s28 = sand.u32 1, %s917_s14  }
  0x18   : > { %1247 = sst [smem:[#allocation17_spill]] %s1019_s26  ;;  %s1029_s29 = sshll.u32 %s183_s28, 2 }
  0x19   : > { %s1248_s27 = scalar_select %p1021_p11, 1, 0 }
  0x1a   : > { %s1032_s30 = sshll.u32 %s925_s16, 6  ;;  %p1036_p13 = pnand %p691_p12, %p1002_p4 }
  0x1b   : > { %s202_s5 = sand.u32 1, %s929_s17   ;;  %s1250_s1 = sld [smem:[#allocation18_spill]] }
  0x1c   : > { %s1249_s4 = scalar_select %p1036_p13, 1, 0 }
  0x1d   : > { %s206_s9 = scalar_lea.vmem [#allocation8], %s1029_s29  ;;  %s1052_s11 = scalar_lea.sflag [#allocation9], %s202_s5 }
  0x1e   : > { %s217_s10 = sshll.u32 %s206_s9, 4  ;;  %p1058_p3 = pneg %p1036_p13  ;;  %s1049_s10 = int_to_ptr.vmem [resolvable:$true] %s217_s10 }
  0x21   : > { %s1045_s8 = scalar_lea.hbm %s1250_s1, %s1032_s30  ;;  %s758_s6 = scalar_lea.hbm %s1250_s1, 512 }
  0x22   : > { %s753_s19 = scalar_lea.hbm %s1045_s8, 64  ;;  %p759_p6 = scmp.lt.u32.totalorder %s1045_s8, %s1250_s1 }
  0x23   : > { %p754_p2 = scmp.ne.s32.totalorder %s1045_s8, %s753_s19  ;;  %p760_p7 = scmp.lt.u32.totalorder %s758_s6, %s753_s19 }
  0x24   : > { %p762_p12 = scmp.lt.u32.totalorder %s753_s19, %s1045_s8 }
  0x25   : > { %p756_p4 = pnand %p1058_p3, %p754_p2  ;;  %p761_p10 = por %p760_p7, %p759_p6 }
  0x27   : > { %p757_p5 = pneg %p756_p4  ;;  %p763_p0 = por %p762_p12, %p761_p10 }
  0x29   : > { %p764_p1 = pnand %p763_p0, %p757_p5 }
  0x2b   : > { %767 = shalt.err (!%p764_p1)
}
  0x2c   : > { %s768_s5 = scalar_lea.vmem %s1049_s10, 64  ;;  %s931_s22 = smov [#allocation8]  }
  0x2d   : > { %p769_p2 = scmp.ne.s32.totalorder %s1049_s10, %s768_s5  ;;  %s773_s23 = sshll.u32 %s931_s22, 4  ;;  %s774_s23 = int_to_ptr.vmem [resolvable:$false] %s773_s23 }
  0x2e   : > { %s775_s7 = scalar_lea.vmem %s774_s23, 128  ;;  %p776_p9 = scmp.lt.s32.totalorder %s1049_s10, %s774_s23 }
  0x2f   : > { %p771_p4 = pnand %p769_p2, %p1058_p3  ;;  %p777_p8 = scmp.lt.s32.totalorder %s775_s7, %s768_s5 }
  0x31   : > { %p772_p11 = pneg %p771_p4  ;;  %p778_p6 = por %p777_p8, %p776_p9 }
  0x33   : > { %p779_p7 = pnand %p778_p6, %p772_p11 }
  0x35   : > { %782 = shalt.err (!%p779_p7)
}
  0x36   : > { %683 = dma.hbm_to_vmem [thread:$0]  (!%p1036_p13), %s1045_s8, 64, %s1049_s10, %s1052_s11  }
  0x37   : > { %p1252_p0 = scmp.lt.s32.totalorder %s929_s17, 9  ;;  %p1253_p1 = scmp.ge.s32.totalorder %s929_s17, 1 }
  0x38   : > { %s1094_s5 = scalar_lea.hbm %s1232_s0, %s1032_s30  ;;  %s187_s22 = scalar_lea.vmem [#allocation5], %s1029_s29 }
  0x39   : > { %p1086_p5 = pnand %p1253_p1, %p1252_p0  ;;  %s195_s23 = sshll.u32 %s187_s22, 4  ;;  %s1097_s23 = int_to_ptr.vmem [resolvable:$true] %s195_s23 }
  0x3a   : > { %s1103_s7 = scalar_lea.hbm %s1234_s2, %s1032_s30  ;;  %s184_s1 = scalar_lea.sflag [#allocation6], %s183_s28 }
  0x3b   : > { %s1254_s19 = scalar_select %p1086_p5, 1, 0 }
  0x3c   : > { %s783_s20 = scalar_lea.hbm %s1094_s5, 64  ;;  %s788_s16 = scalar_lea.hbm %s1232_s0, 512 }
  0x3d   : > { %p784_p8 = scmp.ne.s32.totalorder %s1094_s5, %s783_s20  ;;  %p789_p10 = scmp.lt.u32.totalorder %s1094_s5, %s1232_s0 }
  0x3e   : > { %p790_p12 = scmp.lt.u32.totalorder %s788_s16, %s783_s20  ;;  %p792_p4 = scmp.lt.u32.totalorder %s783_s20, %s1094_s5 }
  0x3f   : > { %p786_p9 = pnand %p784_p8, %p1058_p3 }
  0x40   : > { %p791_p2 = por %p790_p12, %p789_p10 }
  0x41   : > { %p787_p11 = pneg %p786_p9 }
  0x42   : > { %p793_p6 = por %p792_p4, %p791_p2 }
  0x44   : > { %p794_p7 = pnand %p793_p6, %p787_p11 }
  0x46   : > { %797 = shalt.err (!%p794_p7)
}
  0x47   : > { %s798_s28 = scalar_lea.vmem %s1097_s23, 64  ;;  %s932_s30 = smov [#allocation5]  }
  0x48   : > { %p799_p0 = scmp.ne.s32.totalorder %s1097_s23, %s798_s28  ;;  %s803_s8 = sshll.u32 %s932_s30, 4  ;;  %s804_s8 = int_to_ptr.vmem [resolvable:$false] %s803_s8 }
  0x49   : > { %s805_s26 = scalar_lea.vmem %s804_s8, 128  ;;  %p806_p9 = scmp.lt.s32.totalorder %s1097_s23, %s804_s8 }
  0x4a   : > { %p801_p1 = pnand %p799_p0, %p1058_p3  ;;  %p807_p5 = scmp.lt.s32.totalorder %s805_s26, %s798_s28 }
  0x4c   : > { %p802_p8 = pneg %p801_p1  ;;  %p808_p10 = por %p807_p5, %p806_p9 }
  0x4e   : > { %p809_p12 = pnand %p808_p10, %p802_p8 }
  0x50   : > { %812 = shalt.err (!%p809_p12)
}
  0x51   : > { %680 = dma.hbm_to_vmem [thread:$0]  (!%p1036_p13), %s1094_s5, 64, %s1097_s23, %s184_s1  }
  0x52   : > { %s228_s16 = scalar_lea.vmem [#allocation10], %s1029_s29  ;;  %s813_s10 = scalar_lea.hbm %s1103_s7, 64 }
  0x53   : > { %s239_s20 = sshll.u32 %s228_s16, 4  ;;  %p814_p11 = scmp.ne.s32.totalorder %s1103_s7, %s813_s10  ;;  %s240_s20 = int_to_ptr.vmem [resolvable:$true] %s239_s20 }
  0x54   : > { %s818_s22 = scalar_lea.hbm %s1234_s2, 512  ;;  %p819_p4 = scmp.lt.u32.totalorder %s1103_s7, %s1234_s2 }
  0x55   : > { %p816_p5 = pnand %p814_p11, %p1058_p3  ;;  %p820_p6 = scmp.lt.u32.totalorder %s818_s22, %s813_s10 }
  0x56   : > { %p822_p0 = scmp.lt.u32.totalorder %s813_s10, %s1103_s7 }
  0x57   : > { %p817_p2 = pneg %p816_p5  ;;  %p821_p7 = por %p820_p6, %p819_p4 }
  0x59   : > { %p823_p1 = por %p822_p0, %p821_p7 }
  0x5b   : > { %p824_p8 = pnand %p823_p1, %p817_p2 }
  0x5d   : > { %827 = shalt.err (!%p824_p8)
}
  0x5e   : > { %s828_s1 = scalar_lea.vmem %s240_s20, 64  ;;  %s933_s29 = smov [#allocation10]  }
  0x5f   : > { %p829_p9 = scmp.ne.s32.totalorder %s240_s20, %s828_s1  ;;  %s833_s5 = sshll.u32 %s933_s29, 4  ;;  %s834_s5 = int_to_ptr.vmem [resolvable:$false] %s833_s5 }
  0x60   : > { %s835_s23 = scalar_lea.vmem %s834_s5, 128  ;;  %p836_p11 = scmp.lt.s32.totalorder %s240_s20, %s834_s5 }
  0x61   : > { %p831_p10 = pnand %p829_p9, %p1058_p3  ;;  %p837_p5 = scmp.lt.s32.totalorder %s835_s23, %s828_s1 }
  0x63   : > { %p832_p12 = pneg %p831_p10  ;;  %p838_p13 = por %p837_p5, %p836_p11 }
  0x65   : > { %p839_p4 = pnand %p838_p13, %p832_p12 }
  0x67   : > { %842 = shalt.err (!%p839_p4)
}
  0x68   : > { %p1255_p6 = scmp.ne.s32.totalorder %s1249_s4, 0  ;;  %p1256_p2 = scmp.ne.s32.totalorder %s1254_s19, 0 }
  0x69   : > { %s1150_s21 = sand.u32 (!%p1256_p2), 1, %s913_s13   ;;  %p1257_p13 = scmp.ne.s32.totalorder (!%p1256_p2), %s1245_s24, 0 }
  0x6a   : > { %686 = dma.hbm_to_vmem [thread:$0]  (!%p1255_p6), %s1103_s7, 64, %s240_s20, %s1052_s11  }
  0x6b   : > { %248 = sbr.rel (%p1256_p2) target bundleno = 939 (0x3ab), region = 32  ;;  %s1153_s8 = sshll.u32 (!%p1256_p2), %s1150_s21, 2 }
  0x6c   : > { %s251_s26 = scalar_lea.sflag (!%p1256_p2), [#allocation6], %s1150_s21  ;;  %s254_s16 = scalar_lea.vmem (!%p1256_p2), [#allocation5], %s1153_s8 }
  0x72   : > { %896 = dma.done.wait (%p1257_p13), %s251_s26, 64  }
  0x73   : > { %898 = vsyncadd (%p1257_p13), %s251_s26, 4294967232  ;;  %s259_s4 = sand.u32 1, %s990_s18   ;;  %s263_s19 = scalar_lea.vmem [#allocation8], %s1153_s8 }
  0x74   : > { %s260_s11 = scalar_lea.sflag [#allocation9], %s259_s4 }
  0x75   : > { %900 = dma.done.wait (%p1257_p13), %s260_s11, 128  }
  0x76   : > { %902 = vsyncadd (%p1257_p13), %s260_s11, 4294967168  ;;  %vm319_vm0 = vcmask 130048   ;;  %v934_v0 = vmov 0.0   ;;  %vm935_vm1 = vmmov 0   ;;  %v327_v1 = vld [vmem:[%s263_s19] sm:$0xf]  ;;  %v376_v5 = vlaneseq }
  0x77   : > { %657 = vmatprep.subr.bf16.mxu0 %v934_v0  ;;  %320 = vst.msk [vmem:[#allocation4] sm:$0xff] %vm319_vm0, %v934_v0  ;;  %659 = vmatprep.mubr.msk.bf16.mxu0 %vm935_vm1, %v934_v0  ;;  %v333_v2 = vsel %vm319_vm0, %v327_v1, 0  ;;  %v326_v3 = vld [vmem:[%s254_s16] sm:$0xf]  ;;  %vm316_vm2 = vcmask 7168   ;;  %vm391_vm6 = vcmask 64512  }
  0x78   : > { %663 = vmatprep.subr.bf16.mxu1 %v934_v0  ;;  %665 = vmatprep.mubr.msk.bf16.mxu1 %vm935_vm1, %v934_v0  ;;  %v936_v4 = vmov -1e+30   ;;  %318 = vst.msk [vmem:[#allocation3] sm:$0xff] %vm316_vm2, %v934_v0  ;;  %v377_v6 = vshrl.u32 %v376_v5, 7  ;;  %v382_v7 = vand.u32 127, %v376_v5  ;;  %v937_v15 = vmov 0  }
  0x79   : > { %658 = vmatpush3.bf16.xpose.msra.mxu0 %v333_v2  ;;  %317 = vst.msk [vmem:[#allocation2] sm:$0xff] %vm316_vm2, %v936_v4  ;;  %745 = vset.pattern.permute.xlu0 %v937_v15  ;;  %vm427_vm7 = vcmask 1043456   ;;  %s272_s18 = scalar_lea.vmem [#allocation10], %s1153_s8  ;;  %s650_s24 = sshll.u32 %s921_s15, 6  ;;  %vm487_vm8 = vcmask 125952  }
  0x7a   : > { %v385_v8 = vsub.s32 %v377_v6, %v382_v7  ;;  %746 = vset.pattern.permute.xlu1 %v937_v15  ;;  %v423_v20 = vld [vmem:[%s272_s18] sm:$0xf]  ;;  %s304_s7 = scalar_lea.vmem [#allocation11], %s1153_s8  ;;  %s1184_s9 = scalar_lea.hbm %s1235_s3, %s650_s24 }
  0x7b   : > { %v429_v21 = vsel %vm427_vm7, %v423_v20, 0  ;;  %s504_s20 = sshll.u32 %s304_s7, 4  ;;  %s490_s22 = scalar_lea.sflag [#allocation7], %s1150_s21  ;;  %s1186_s20 = int_to_ptr.vmem [resolvable:$true] %s504_s20 }
  0x7c   : > { %vm386_vm3 = vcmp.lt.s32.totalorder %v385_v8, 0  ;;  %vm387_vm4 = vcmp.ge.s32.totalorder %v385_v8, 4  ;;  %664 = vmatpush3.bf16.msra.mxu1 %v429_v21  ;;  %s843_s28 = scalar_lea.vmem %s1186_s20, 64  ;;  %p1258_p7 = scmp.ne.s32.totalorder %s1246_s25, 0 }
  0x7d   : > { %vm388_vm5 = vmor %vm386_vm3, %vm387_vm4  ;;  %p844_p3 = scmp.ne.s32.totalorder %s1186_s20, %s843_s28  ;;  %s938_s15 = smov [#allocation11]  }
  0x7e   : > { %v415_v36 = vld [vmem:[#allocation4] sm:$0xff]  ;;  %s847_s30 = sshll.u32 %s938_s15, 4  ;;  %s848_s30 = int_to_ptr.vmem [resolvable:$false] %s847_s30 }
  0x7f   : > { %v407_v30 = vld [vmem:[#allocation3] sm:$0xff]  ;;  %p845_p0 = pnand %p844_p3, %p1258_p7  ;;  %s849_s1 = scalar_lea.vmem %s848_s30, 128 }
  0x80   : > { %660 = vmatmul.mubr.msk.bf16.vlgmr.msra.gmra.mrb[0].mxu0 %vm319_vm0, %v326_v3  ;;  %v390_v16 = vld [vmem:[#allocation2] sm:$0xff]  ;;  %p850_p8 = scmp.lt.s32.totalorder %s1186_s20, %s848_s30  ;;  %p851_p9 = scmp.lt.s32.totalorder %s849_s1, %s843_s28 }
  0x81   : > { %p846_p1 = pneg %p845_p0 }
  0x82   : > { %p852_p10 = por %p851_p9, %p850_p8 }
  0x84   : > { %p853_p12 = pnand %p852_p10, %p846_p1 }
 0x153   : > { %v369_v9 = vpop.f32.mrb[0].mxu0 }
 0x154   : > { %v389_v10 = vsel %vm388_vm5, -1e+30, %v369_v9  ;;  %v661_v11 = vpop.f32.mrb[1].mxu0 }
 0x155   : > { %v372_v12 = vpop.f32.mrb[2].mxu0  ;;  %v392_v13 = vsel %vm391_vm6, %v389_v10, -inf }
 0x156   : > { %393 = vmax.xlane.f32.xlu0 %v392_v13  ;;  %v662_v14 = vpop.f32.mrb[3].mxu0 }
 0x1e3   : > { %v394_v17 = vpop.xlane.xlu0 %393 }
 0x1e4   : > { %v395_v18 = vmax.f32 %v390_v16, %v394_v17 }
 0x1e6   : > { %v396_v19 = vsub.f32 %v390_v16, %v395_v18  ;;  %473 = vst.msk [vmem:[#allocation2] sm:$0xff] %vm316_vm2, %v395_v18  ;;  %401 = vperm.xlu0 %745, %v395_v18  }
 0x1e8   : > { %v397_v28 = vmul.f32 1.442695, %v396_v19 }
 0x265   : > { %v402_v22 = vpop.permute.xlu0 %401 }
 0x266   : > { %v404_v23 = vsub.f32 %v389_v10, %v402_v22 }
 0x268   : > { %v405_v24 = vmul.f32 1.442695, %v404_v23 }
 0x26a   : > { %747 = vpow2.f32 %v405_v24 }
 0x26b   : > { %749 = vpow2.f32 %v397_v28 }
 0x274   : > { %v748_v25 = vpop.eup %747 }
 0x275   : > { %v409_v26 = vsel %vm391_vm6, %v748_v25, 0.0  ;;  %v422_v27 = vpack.c.bf16 %v748_v25, %v748_v25  ;;  %v750_v29 = vpop.eup %749 }
 0x276   : > { %410 = vadd.xlane.f32.xlu1 %v409_v26  ;;  %v408_v31 = vmul.f32 %v750_v29, %v407_v30 }
 0x277   : > { %666 = vmatmul.mubr.msk.bf16.vlgmr.msra.gmra.mrb[0].mxu1 %vm391_vm6, %v422_v27 }
 0x287   : > { %418 = vperm.xlu1 %746, %v750_v29  }
 0x303   : > { %v411_v32 = vpop.xlane.xlu1 %410 }
 0x304   : > { %v412_v33 = vadd.f32 %v411_v32, %v408_v31 }
 0x306   : > { %414 = vst.msk [vmem:[#allocation3] sm:$0xff] %vm316_vm2, %v412_v33 }
 0x307   : > { %v419_v37 = vpop.permute.xlu1 %418 }
 0x308   : > { %v421_v38 = vmul.f32 %v419_v37, %v415_v36 }
 0x30d   : > { %v478_v34 = vld [vmem:[#allocation3] sm:$0xff] }
 0x30e   : > { %751 = vrcp.f32 %v478_v34 }
 0x318   : > { %v752_v35 = vpop.eup %751 }
 0x319   : > { %482 = vperm.xlu1 %746, %v752_v35  }
 0x34a   : > { %v465_v39 = vpop.f32.mrb[0].mxu1 }
 0x34b   : > { %v471_v40 = vadd.f32 %v465_v39, %v421_v38  ;;  %v667_v41 = vpop.f32.mrb[1].mxu1 }
 0x34c   : > { %v468_v42 = vpop.f32.mrb[2].mxu1 }
 0x34d   : > { %472 = vst.msk [vmem:[#allocation4] sm:$0xff] %vm319_vm0, %v471_v40  ;;  %v668_v43 = vpop.f32.mrb[3].mxu1 }
 0x354   : > { %v477_v44 = vld [vmem:[#allocation4] sm:$0xff] }
 0x398   : > { %v483_v45 = vpop.permute.xlu1 %482 }
 0x399   : > { %v485_v46 = vmul.f32 %v483_v45, %v477_v44 }
 0x39b   : > { %v486_v47 = vpack.c.bf16 %v485_v46, %v485_v46 }
 0x39d   : > { %488 = vst.msk [vmem:[%s304_s7] sm:$0xf] %vm487_vm8, %v486_v47 }
 0x39e   : > { %856 = shalt.err (!%p853_p12)
}
 0x39f   : > { %s857_s29 = scalar_lea.hbm %s1184_s9, 64  ;;  %s861_s21 = scalar_lea.hbm %s1235_s3, 512 }
 0x3a0   : > { %p858_p11 = scmp.ne.s32.totalorder %s1184_s9, %s857_s29  ;;  %p862_p6 = scmp.lt.u32.totalorder %s1184_s9, %s1235_s3 }
 0x3a1   : > { %p863_p2 = scmp.lt.u32.totalorder %s861_s21, %s857_s29  ;;  %p865_p3 = scmp.lt.u32.totalorder %s857_s29, %s1184_s9 }
 0x3a2   : > { %p859_p5 = pnand %p858_p11, %p1258_p7 }
 0x3a3   : > { %p864_p13 = por %p863_p2, %p862_p6 }
 0x3a4   : > { %p860_p4 = pneg %p859_p5 }
 0x3a5   : > { %p866_p0 = por %p865_p3, %p864_p13 }
 0x3a7   : > { %p867_p1 = pnand %p866_p0, %p860_p4 }
 0x3a9   : > { %870 = shalt.err (!%p867_p1)
}
 0x3aa   : > { %675 = dma.vmem_to_hbm [thread:$0]  (%p1258_p7), %s1186_s20, 64, %s1184_s9, %s490_s22  }
 0x3ab PF: > { %p692_p8 = scmp.ge.s32.totalorder %s929_s17, 2  ;;  %s516_s16 = sand.u32 1, %s909_s12  }
 0x3ac   : > { %p1259_p9 = scmp.ne.s32.totalorder %s1248_s27, 0  ;;  %s517_s4 = scalar_lea.sflag [#allocation7], %s516_s16 }
 0x3ae   : > { %p688_p10 = pnand %p692_p8, %p1259_p9 }
 0x3b0   : > { %904 = dma.done.wait (!%p688_p10), %s517_s4, 64  }
 0x3b1   : > { %906 = vsyncadd (!%p688_p10), %s517_s4, 4294967232  ;;  %s22_s17 = sadd.s32 1, %s929_s17   ;;  %s1260_s25 = sld [smem:[#allocation17_spill]] }
 0x3b2   : > { %p19_p12 = scmp.ge.s32.totalorder %s22_s17, 10   ;;  %s1261_s15 = sld [smem:[#allocation15_spill]] }
 0x3b3   : > { %s1262_s16 = sld [smem:[#allocation16_spill]]  ;;  %s1263_s12 = smov %s913_s13 }
 0x3b4   : > { %s1264_s13 = smov %s917_s14  ;;  %21 = sbr.rel (!%p19_p12) target bundleno = 10 (0xa), region = 113 }
 0x3b7   : > { %s1265_s14 = smov %s1260_s25 }
 0x3bb   :  { %522 = vsyncpa [#allocation6], 1 }
 0x3bc   :  { %524 = vsyncpa [#allocation6 + $0x1], 1 }
 0x3bd   :  { %525 = vsyncpa [#allocation9], 1 }
 0x3be   :  { %527 = vsyncpa [#allocation9 + $0x1], 1 }
 0x3bf   :  { %528 = vsyncpa [#allocation7], 1 }
 0x3c0   :  { %530 = vsyncpa [#allocation7 + $0x1], 1 }

</bundles_post_ra>
